<compile_context>
chip_gen: v7x
topology: tpu7x:2x2x1
jax: 0.10.0
libtpu: 0.0.40
codegen_flags: <defaults>
</compile_context>

<pallas_src>
import functools
import math

import jax
import jax.numpy as jnp
from jax.experimental import pallas as pl
from jax.experimental.pallas import tpu as pltpu


def _policy_kernel(consts_ref, states_ref, noise_ref,
                   w1_ref, b1_ref, w2_ref, b2_ref, std_ref,
                   out_ref, *, A):
    """One batch tile of the Policy forward pass.

    out_ref columns: [0:A) actions | A: log_prob | A+1: entropy | A+2: value | zero pad.
    consts_ref (SMEM): [0] = -(sum(log std) + 0.5*A*log(2*pi)), [1] = entropy constant.
    """
    x = states_ref[...]                                                # (bm, S) f32

    # ---- fused layer 1: [actor_hidden | critic_hidden] in a single MXU push ----
    y1 = jnp.tanh(jnp.dot(x, w1_ref[...],
                          preferred_element_type=jnp.float32) + b1_ref[...])   # (bm, 2H)

    # ---- fused layer 2: block-diagonal weight -> [actor_mean_preact | value] ----
    z = jnp.dot(y1, w2_ref[...],
                preferred_element_type=jnp.float32) + b2_ref[...]              # (bm, A+1)
    mu = jnp.tanh(z[:, :A])                                            # Normal mean (bm, A)
    v = z[:, A:A + 1]                                                  # critic value (bm, 1)

    # ---- Normal(mu, std): reparameterized sample ----
    noise = noise_ref[...]                                             # (bm, A) ~ N(0,1)
    actions = mu + std_ref[...] * noise

    # log_prob: (actions - mu) == std * noise exactly inside this kernel, so
    #   sum_A log N(a | mu, std) = -0.5 * sum(noise^2) - sum(log std) - 0.5*A*log(2*pi)
    # The parameter-only constant is hoisted to the wrapper (consts_ref[0]).
    logp = consts_ref[0] - 0.5 * jnp.sum(noise * noise, axis=1, keepdims=True)  # (bm, 1)

    bm = out_ref.shape[0]
    # Entropy is batch-independent; splat the precomputed constant.
    ent = jnp.zeros((bm, 1), jnp.float32) + consts_ref[1]              # (bm, 1)

    pad = jnp.zeros((bm, out_ref.shape[1] - (A + 3)), jnp.float32)
    # Single lane-dense store: one unmasked write-back instead of four narrow masked ones.
    out_ref[...] = jnp.concatenate([actions, logp, ent, v, pad], axis=1)


def policy_forward(states, noise, params, *, bm_max=512):
    """Policy forward pass. Returns (actions, log_prob, entropy, values)."""
    B, S = states.shape
    H = params["aw1"].shape[1]
    A = params["aw2"].shape[1]
    OUT = 128 * ((A + 3 + 127) // 128)            # lane-dense packed output width

    # ---- one-time weight fusion (layer-1 side-by-side, layer-2 block-diagonal) ----
    w1 = jnp.concatenate([params["aw1"], params["cw1"]], axis=1)              # (S, 2H)
    b1 = jnp.concatenate([params["ab1"], params["cb1"]], axis=1)              # (1, 2H)
    w2 = jnp.concatenate(
        [jnp.concatenate([params["aw2"], jnp.zeros((H, 1), jnp.float32)], axis=1),
         jnp.concatenate([jnp.zeros((H, A), jnp.float32), params["cw2"]], axis=1)],
        axis=0)                                                               # (2H, A+1)
    b2 = jnp.concatenate([params["ab2"], params["cb2"]], axis=1)              # (1, A+1)
    std = params["std"]                                                       # (1, A)

    # ---- parameter-only constants (hoisted out of the kernel) ----
    log2pi = math.log(2.0 * math.pi)
    log_std_sum = jnp.sum(jnp.log(std))
    logp_const = -(log_std_sum + 0.5 * A * log2pi)
    ent_const = A * (0.5 + 0.5 * log2pi) + log_std_sum
    consts = jnp.stack([logp_const, ent_const]).astype(jnp.float32)           # (2,) -> SMEM

    # ---- batch tiling: grid over B so v7x's two TensorCores both get work ----
    bm = B if B <= bm_max else bm_max            # bm<=512 keeps VMEM footprint tiny on all gens
    nb = (B + bm - 1) // bm
    Bp = nb * bm
    if Bp != B:
        states = jnp.pad(states, ((0, Bp - B), (0, 0)))
        noise = jnp.pad(noise, ((0, Bp - B), (0, 0)))

    kernel = functools.partial(_policy_kernel, A=A)
    packed = pl.pallas_call(
        kernel,
        out_shape=jax.ShapeDtypeStruct((Bp, OUT), jnp.float32),
        grid=(nb,),
        in_specs=[
            pl.BlockSpec(memory_space=pltpu.MemorySpace.SMEM),   # consts (scalars)
            pl.BlockSpec((bm, S), lambda i: (i, 0)),             # states (tiled over batch)
            pl.BlockSpec((bm, A), lambda i: (i, 0)),             # noise  (tiled over batch)
            pl.BlockSpec((S, 2 * H), lambda i: (0, 0)),          # fused W1 (resident)
            pl.BlockSpec((1, 2 * H), lambda i: (0, 0)),          # fused b1
            pl.BlockSpec((2 * H, A + 1), lambda i: (0, 0)),      # fused block-diag W2
            pl.BlockSpec((1, A + 1), lambda i: (0, 0)),          # fused b2
            pl.BlockSpec((1, A), lambda i: (0, 0)),              # std
        ],
        out_specs=pl.BlockSpec((bm, OUT), lambda i: (i, 0)),
        compiler_params=pltpu.CompilerParams(
            dimension_semantics=("parallel",)),
    )(consts, states, noise, w1, b1, w2, b2, std)

    actions = packed[:B, :A]
    log_prob = packed[:B, A:A + 1]
    entropy = packed[:B, A + 1:A + 2]
    values = packed[:B, A + 2:A + 3]
    return actions, log_prob, entropy, values


def _reference(states, noise, p):
    """Pure-JAX reference (mirrors the PyTorch module, unfused weights)."""
    h = jnp.tanh(states @ p["aw1"] + p["ab1"])
    mu = jnp.tanh(h @ p["aw2"] + p["ab2"])
    hc = jnp.tanh(states @ p["cw1"] + p["cb1"])
    v = hc @ p["cw2"] + p["cb2"]
    std = p["std"]
    actions = mu + std * noise
    log2pi = math.log(2.0 * math.pi)
    lp = -((actions - mu) ** 2) / (2.0 * std * std) - jnp.log(std) - 0.5 * log2pi
    logp = jnp.sum(lp, axis=1, keepdims=True)
    ent = jnp.sum(jnp.broadcast_to(0.5 + 0.5 * log2pi + jnp.log(std), actions.shape),
                  axis=1, keepdims=True)
    return actions, logp, ent, v


if __name__ == "__main__":
    # Small shapes consistent with the module's forward:
    B, S, H, A = 8, 32, 32, 4   # batch, state_size, hidden, action_size

    key = jax.random.PRNGKey(0)
    ks = jax.random.split(key, 8)

    params = {
        "aw1": jax.random.normal(ks[0], (S, H), jnp.float32) * 0.1,
        "ab1": jax.random.normal(ks[1], (1, H), jnp.float32) * 0.1,
        "aw2": jax.random.normal(ks[2], (H, A), jnp.float32) * 0.1,
        "ab2": jax.random.normal(ks[3], (1, A), jnp.float32) * 0.1,
        "cw1": jax.random.normal(ks[4], (S, H), jnp.float32) * 0.1,
        "cb1": jax.random.normal(ks[5], (1, H), jnp.float32) * 0.1,
        "cw2": jax.random.normal(ks[6], (H, 1), jnp.float32) * 0.1,
        "cb2": jnp.zeros((1, 1), jnp.float32),
        "std": jnp.ones((1, A), jnp.float32),   # nn.Parameter(torch.ones(1, action_size))
    }

    kx, kn = jax.random.split(jax.random.PRNGKey(0))
    states = jax.random.normal(kx, (B, S), jnp.float32)
    noise = jax.random.normal(kn, (B, A), jnp.float32)   # standard-normal draw for dist.sample()

    actions, log_prob, entropy, values = jax.block_until_ready(
        policy_forward(states, noise, params))

    ra, rl, re, rv = _reference(states, noise, params)
    assert actions.shape == (B, A) and log_prob.shape == (B, 1)
    assert entropy.shape == (B, 1) and values.shape == (B, 1)
    assert jnp.allclose(actions, ra, atol=1e-4)
    assert jnp.allclose(log_prob, rl, atol=1e-4)
    assert jnp.allclose(entropy, re, atol=1e-4)
    assert jnp.allclose(values, rv, atol=1e-4)

    print("KERNEL_OK")
</pallas_src>

<mosaic_0001>
module attributes {stable_mosaic.version = 11 : i64} {
  func.func @_policy_kernel(%arg0: i32, %arg1: memref<2xf32, #tpu.memory_space<smem>>, %arg2: memref<8x32xf32, #tpu.memory_space<vmem>>, %arg3: memref<8x4xf32, #tpu.memory_space<vmem>>, %arg4: memref<32x64xf32, #tpu.memory_space<vmem>>, %arg5: memref<1x64xf32, #tpu.memory_space<vmem>>, %arg6: memref<64x5xf32, #tpu.memory_space<vmem>>, %arg7: memref<1x5xf32, #tpu.memory_space<vmem>>, %arg8: memref<1x4xf32, #tpu.memory_space<vmem>>, %arg9: memref<8x128xf32, #tpu.memory_space<vmem>>) attributes {dimension_semantics = [#tpu.dimension_semantics<parallel>], iteration_bounds = array<i64: 1>, scalar_prefetch = 0 : i64, scratch_operands = 0 : i64, tpu.core_type = #tpu.core_type<tc>, window_params = [{transform_indices = @transform_0, window_bounds = array<i64: 2>}, {transform_indices = @transform_1, window_bounds = array<i64: 8, 32>}, {transform_indices = @transform_2, window_bounds = array<i64: 8, 4>}, {pipeline_mode = #tpu.pipeline_mode<synchronous>, transform_indices = @transform_3, window_bounds = array<i64: 32, 64>}, {pipeline_mode = #tpu.pipeline_mode<synchronous>, transform_indices = @transform_4, window_bounds = array<i64: 1, 64>}, {pipeline_mode = #tpu.pipeline_mode<synchronous>, transform_indices = @transform_5, window_bounds = array<i64: 64, 5>}, {pipeline_mode = #tpu.pipeline_mode<synchronous>, transform_indices = @transform_6, window_bounds = array<i64: 1, 5>}, {pipeline_mode = #tpu.pipeline_mode<synchronous>, transform_indices = @transform_7, window_bounds = array<i64: 1, 4>}, {transform_indices = @transform_8, window_bounds = array<i64: 8, 128>}]} {
    %c0 = arith.constant 0 : index
    %c0_0 = arith.constant 0 : index
    %0 = vector.load %arg2[%c0, %c0_0] : memref<8x32xf32, #tpu.memory_space<vmem>>, vector<8x32xf32>
    %c0_1 = arith.constant 0 : index
    %c0_2 = arith.constant 0 : index
    %1 = vector.load %arg4[%c0_1, %c0_2] : memref<32x64xf32, #tpu.memory_space<vmem>>, vector<32x64xf32>
    %cst = arith.constant dense<0.000000e+00> : vector<8x64xf32>
    %2 = tpu.matmul %0, %1, %cst {dimension_numbers = #tpu.dot_dimension_numbers<[1], [0], [0], [1], [0, 0, 1, 1], [], []>} : vector<8x32xf32>, vector<32x64xf32>, vector<8x64xf32> -> vector<8x64xf32>
    %c0_3 = arith.constant 0 : index
    %c0_4 = arith.constant 0 : index
    %3 = vector.load %arg5[%c0_3, %c0_4] : memref<1x64xf32, #tpu.memory_space<vmem>>, vector<1x64xf32>
    %4 = vector.broadcast %3 : vector<1x64xf32> to vector<8x64xf32>
    %5 = arith.addf %2, %4 : vector<8x64xf32>
    %6 = math.tanh %5 : vector<8x64xf32>
    %c0_5 = arith.constant 0 : index
    %c0_6 = arith.constant 0 : index
    %7 = vector.load %arg6[%c0_5, %c0_6] : memref<64x5xf32, #tpu.memory_space<vmem>>, vector<64x5xf32>
    %cst_7 = arith.constant dense<0.000000e+00> : vector<8x5xf32>
    %8 = tpu.matmul %6, %7, %cst_7 {dimension_numbers = #tpu.dot_dimension_numbers<[1], [0], [0], [1], [0, 0, 1, 1], [], []>} : vector<8x64xf32>, vector<64x5xf32>, vector<8x5xf32> -> vector<8x5xf32>
    %c0_8 = arith.constant 0 : index
    %c0_9 = arith.constant 0 : index
    %9 = vector.load %arg7[%c0_8, %c0_9] : memref<1x5xf32, #tpu.memory_space<vmem>>, vector<1x5xf32>
    %10 = vector.broadcast %9 : vector<1x5xf32> to vector<8x5xf32>
    %11 = arith.addf %8, %10 : vector<8x5xf32>
    %12 = vector.extract_strided_slice %11 {offsets = [0, 0], sizes = [8, 4], strides = [1, 1]} : vector<8x5xf32> to vector<8x4xf32>
    %13 = math.tanh %12 : vector<8x4xf32>
    %14 = vector.extract_strided_slice %11 {offsets = [0, 4], sizes = [8, 1], strides = [1, 1]} : vector<8x5xf32> to vector<8x1xf32>
    %c0_10 = arith.constant 0 : index
    %c0_11 = arith.constant 0 : index
    %15 = vector.load %arg3[%c0_10, %c0_11] : memref<8x4xf32, #tpu.memory_space<vmem>>, vector<8x4xf32>
    %c0_12 = arith.constant 0 : index
    %c0_13 = arith.constant 0 : index
    %16 = vector.load %arg8[%c0_12, %c0_13] : memref<1x4xf32, #tpu.memory_space<vmem>>, vector<1x4xf32>
    %17 = vector.broadcast %16 : vector<1x4xf32> to vector<8x4xf32>
    %18 = arith.mulf %17, %15 : vector<8x4xf32>
    %19 = arith.addf %13, %18 : vector<8x4xf32>
    %c0_14 = arith.constant 0 : index
    %20 = memref.load %arg1[%c0_14] : memref<2xf32, #tpu.memory_space<smem>>
    %21 = arith.mulf %15, %15 : vector<8x4xf32>
    %cst_15 = arith.constant dense<0.000000e+00> : vector<8xf32>
    %22 = vector.multi_reduction <add>, %21, %cst_15 [1] : vector<8x4xf32> to vector<8xf32>
    %23 = vector.shape_cast %22 : vector<8xf32> to vector<8x1xf32>
    %cst_16 = arith.constant 5.000000e-01 : f32
    %24 = vector.broadcast %cst_16 : f32 to vector<8x1xf32>
    %25 = arith.mulf %24, %23 : vector<8x1xf32>
    %26 = vector.broadcast %20 : f32 to vector<8x1xf32>
    %27 = arith.subf %26, %25 : vector<8x1xf32>
    %cst_17 = arith.constant 0.000000e+00 : f32
    %28 = vector.broadcast %cst_17 : f32 to vector<8x1xf32>
    %c1 = arith.constant 1 : index
    %29 = memref.load %arg1[%c1] : memref<2xf32, #tpu.memory_space<smem>>
    %30 = vector.broadcast %29 : f32 to vector<8x1xf32>
    %31 = arith.addf %28, %30 : vector<8x1xf32>
    %cst_18 = arith.constant 0.000000e+00 : f32
    %32 = vector.broadcast %cst_18 : f32 to vector<8x121xf32>
    %33 = tpu.concatenate %19, %27, %31, %14, %32 in 1 : vector<8x4xf32>, vector<8x1xf32>, vector<8x1xf32>, vector<8x1xf32>, vector<8x121xf32> -> vector<8x128xf32>
    %c0_19 = arith.constant 0 : index
    %c0_20 = arith.constant 0 : index
    %34 = vector.load %arg9[%c0_19, %c0_20] : memref<8x128xf32, #tpu.memory_space<vmem>>, vector<8x128xf32>
    tpu.vector_store %arg9[%c0_19, %c0_20], %33 {strides = array<i32>} : memref<8x128xf32, #tpu.memory_space<vmem>>, vector<8x128xf32>,
    return
  }
  func.func @transform_0(%arg0: i32) -> i32 {
    %c0_i32 = arith.constant 0 : i32
    %c0_i32_0 = arith.constant 0 : i32
    return %c0_i32 : i32
  }
  func.func @transform_1(%arg0: i32) -> (i32, i32) {
    %c0_i32 = arith.constant 0 : i32
    %c0_i32_0 = arith.constant 0 : i32
    return %arg0, %c0_i32 : i32, i32
  }
  func.func @transform_2(%arg0: i32) -> (i32, i32) {
    %c0_i32 = arith.constant 0 : i32
    %c0_i32_0 = arith.constant 0 : i32
    return %arg0, %c0_i32 : i32, i32
  }
  func.func @transform_3(%arg0: i32) -> (i32, i32) {
    %c0_i32 = arith.constant 0 : i32
    %c0_i32_0 = arith.constant 0 : i32
    %c0_i32_1 = arith.constant 0 : i32
    return %c0_i32, %c0_i32_0 : i32, i32
  }
  func.func @transform_4(%arg0: i32) -> (i32, i32) {
    %c0_i32 = arith.constant 0 : i32
    %c0_i32_0 = arith.constant 0 : i32
    %c0_i32_1 = arith.constant 0 : i32
    return %c0_i32, %c0_i32_0 : i32, i32
  }
  func.func @transform_5(%arg0: i32) -> (i32, i32) {
    %c0_i32 = arith.constant 0 : i32
    %c0_i32_0 = arith.constant 0 : i32
    %c0_i32_1 = arith.constant 0 : i32
    return %c0_i32, %c0_i32_0 : i32, i32
  }
  func.func @transform_6(%arg0: i32) -> (i32, i32) {
    %c0_i32 = arith.constant 0 : i32
    %c0_i32_0 = arith.constant 0 : i32
    %c0_i32_1 = arith.constant 0 : i32
    return %c0_i32, %c0_i32_0 : i32, i32
  }
  func.func @transform_7(%arg0: i32) -> (i32, i32) {
    %c0_i32 = arith.constant 0 : i32
    %c0_i32_0 = arith.constant 0 : i32
    %c0_i32_1 = arith.constant 0 : i32
    return %c0_i32, %c0_i32_0 : i32, i32
  }
  func.func @transform_8(%arg0: i32) -> (i32, i32) {
    %c0_i32 = arith.constant 0 : i32
    %c0_i32_0 = arith.constant 0 : i32
    return %arg0, %c0_i32 : i32, i32
  }
}

</mosaic_0001>

<bundles_post_ra>
// kernel: tpu_custom_call.1
= control target key start
LH: loop header
LB: loop body
LE: loop exit
PB: predicated region body
PF: predicated region fallthrough
CT: control target
= control target key end

     0   :  { %13 = vsyncpa [#allocation4], 0  ;;  %s504_s0 = inlined_call_operand.vmem [shape: f32[2], index: 0, kind: input, shape index: {}]   ;;  %s505_s1 = inlined_call_operand.vmem [shape: f32[8,32], index: 1, kind: input, shape index: {}]   ;;  %s506_s2 = inlined_call_operand.vmem [shape: f32[8,4], index: 2, kind: input, shape index: {}]   ;;  %s507_s3 = inlined_call_operand.vmem [shape: f32[32,64], index: 3, kind: input, shape index: {}]   ;;  %s508_s4 = inlined_call_operand.vmem [shape: f32[1,64], index: 4, kind: input, shape index: {}]   ;;  %s509_s5 = inlined_call_operand.vmem [shape: f32[64,5], index: 5, kind: input, shape index: {}]   ;;  %s510_s6 = inlined_call_operand.vmem [shape: f32[1,5], index: 6, kind: input, shape index: {}]   ;;  %s511_s7 = inlined_call_operand.vmem [shape: f32[1,4], index: 7, kind: input, shape index: {}]   ;;  %s512_s8 = inlined_call_operand.hbm [shape: f32[8,128], index: 8, kind: output, shape index: {}]  }
   0x1   :  { %14 = vsyncpa [#allocation3], 0  ;;  %s21_s29 = sshll.u32 %s504_s0, 4  ;;  %s22_s29 = int_to_ptr.vmem [resolvable:$true] %s21_s29 }
   0x2   :  { %s347_s30 = scalar_lea.vmem %s22_s29, 16  ;;  %p352_p1 = scmp.lt.s32.totalorder %s22_s29, %s22_s29 }
   0x3   :  { %p348_p0 = scmp.ne.s32.totalorder %s22_s29, %s347_s30  ;;  %p353_p2 = scmp.lt.s32.totalorder %s347_s30, %s347_s30 }
   0x5   :  { %p354_p3 = por %p353_p2, %p352_p1 }
   0x7   :  { %p355_p4 = pnand %p354_p3, %p348_p0 }
   0x9   :  { %358 = shalt.err (!%p355_p4)
}
   0xa   :  { %s385_s9 = smov [#allocation2]  }
   0xb   :  { %24 = dma.vmem_to_smem %s22_s29, 16, %s385_s9, [#allocation4]  }
   0xc   :  { %381 = dma.done.wait [#allocation4], 16  }
   0xd   :  { %382 = vsyncadd [#allocation4], 4294967280 }
   0xe   :  { %42 = sfence }
   0xf   :  { %v44_v0 = vld [vmem:[%s507_s3] sm:$0xff]  ;;  %v45_v1 = vld [vmem:[%s507_s3 + $0x8] sm:$0xff]  ;;  %v46_v2 = vld [vmem:[%s507_s3 + $0x10] sm:$0xff]  ;;  %v386_v3 = vmov 0.0|0.0   ;;  %vm387_vm0 = vmmov 0   ;;  %v388_v6 = vmov 0.0  }
  0x10   :  { %319 = vmatprep.subr.bf16.mxu0 %v386_v3  ;;  %v320_v4 = vpack.c.bf16 %v45_v1, %v44_v0  ;;  %v47_v5 = vld [vmem:[%s507_s3 + $0x18] sm:$0xff]  ;;  %297 = vmatprep.mubr.msk.f32.mxu0 %vm387_vm0, %v388_v6  ;;  %v130_v7 = vld [vmem:[%s509_s5] sm:$0xff]  ;;  %v131_v8 = vld [vmem:[%s509_s5 + $0x8] sm:$0xff]  ;;  %vm55_vm1 = vcmask 261120   ;;  %vm232_vm2 = vcmask 31744   ;;  %vm145_vm3 = vcmask 523264  }
  0x11   :  { %325 = vmatprep.subr.bf16.mxu1 %v386_v3  ;;  %316 = vmatprep.mubr.msk.f32.mxu1 %vm387_vm0, %v388_v6  ;;  %v323_v9 = vpack.c.bf16 %v47_v5, %v46_v2  ;;  %v326_v10 = vpack.c.bf16 %v131_v8, %v130_v7  ;;  %v43_v11 = vld [vmem:[%s505_s1] sm:$0xff]  ;;  %v132_v12 = vld [vmem:[%s509_s5 + $0x10] sm:$0xff]  ;;  %v133_v13 = vld [vmem:[%s509_s5 + $0x18] sm:$0xff]  ;;  %s274_s17 = sld [smem:[#allocation2 + $0x1]]  ;;  %vm247_vm4 = vcmask 39936   ;;  %vm249_vm5 = vcmask 48128  }
  0x12   :  { %321 = vmatpush3.bf16.msra.mxu0 %v320_v4  ;;  %v329_v14 = vpack.c.bf16 %v133_v13, %v132_v12  ;;  %v134_v15 = vld [vmem:[%s509_s5 + $0x20] sm:$0xff]  ;;  %v135_v16 = vld [vmem:[%s509_s5 + $0x28] sm:$0xff]  ;;  %v136_v18 = vld [vmem:[%s509_s5 + $0x30] sm:$0xff]  ;;  %vm251_vm6 = vcmask 56320  }
  0x13   :  { %322 = vmatprep.subr.bf16.mxu0 %v386_v3  ;;  %327 = vmatpush3.bf16.msra.mxu1 %v326_v10  ;;  %v332_v17 = vpack.c.bf16 %v135_v16, %v134_v15  ;;  %v137_v19 = vld [vmem:[%s509_s5 + $0x38] sm:$0xff]  ;;  %v220_v21 = vld [vmem:[%s506_s2] sm:$0xff]  ;;  %s389_s2 = smov 2  }
  0x14   :  { %328 = vmatprep.subr.bf16.mxu1 %v386_v3  ;;  %v335_v20 = vpack.c.bf16 %v137_v19, %v136_v18  ;;  %v231_v22 = vmul.f32 %v220_v21, %v220_v21  ;;  %v269_v24 = vld [vmem:[%s508_s4] ss:$0 sm:$0xff]  ;;  %s230_s4 = sld [smem:[#allocation2]] }
  0x15   :  { %v271_v29 = vld [vmem:[%s510_s6] ss:$0 sm:$0xff]  ;;  %s390_s6 = smov [#allocation5]  }
  0x16   :  { %324 = vmatpush3.bf16.msra.mxu0 %v323_v9  ;;  %v233_v23 = vsel %vm232_vm2, %v231_v22, 0.0  ;;  %v273_v33 = vld [vmem:[%s511_s7] ss:$0 sm:$0xff]  ;;  %s260_s18 = sshll.u32 %s390_s6, 4  ;;  %s261_s18 = int_to_ptr.vmem [resolvable:$true] %s260_s18 }
  0x17   :  { %330 = vmatpush3.bf16.msra.mxu1 %v329_v14  ;;  %234 = vadd.xlane.f32.xlu0 %v233_v23  ;;  %v228_v34 = vmul.f32 %v273_v33, %v220_v21  ;;  %v240_v41 = vstv %s274_s17  ;;  %s359_s7 = scalar_lea.vmem %s261_s18, 128  ;;  %p364_p6 = scmp.lt.s32.totalorder %s261_s18, %s261_s18 }
  0x18   :  { %331 = vmatprep.subr.bf16.mxu1 %v386_v3  ;;  %p360_p5 = scmp.ne.s32.totalorder %s261_s18, %s359_s7  ;;  %p365_p7 = scmp.lt.s32.totalorder %s359_s7, %s359_s7 }
  0x19   :  { %298 = vmatmul.mubr.msk.f32.vlgmr.msra.gmra.mrb[0].mxu0 %vm55_vm1, %v43_v11 }
  0x1a   :  { %v237_v39 = vstv %s230_s4  ;;  %p366_p8 = por %p365_p7, %p364_p6 }
  0x1b   :  { %333 = vmatpush3.bf16.msra.mxu1 %v332_v17 }
  0x1c   :  { %334 = vmatprep.subr.bf16.mxu1 %v386_v3  ;;  %p367_p9 = pnand %p366_p8, %p360_p5 }
  0x1f   :  { %336 = vmatpush3.bf16.msra.mxu1 %v335_v20 }
  0xa4   :  { %v235_v37 = vpop.xlane.xlu0 %234 }
  0xa5   :  { %v236_v38 = vmul.f32 0.5, %v235_v37 }
  0xa7   :  { %v238_v40 = vsub.f32 %v237_v39, %v236_v38 }
  0xec   :  { %v125_v25 = vpop.f32.mrb[0].mxu0 }
  0xed   :  { %v126_v26 = vadd.f32 %v269_v24, %v125_v25  ;;  %v299_v27 = vpop.f32.mrb[1].mxu0 }
  0xef   :  { %343 = vtanh.f32 %v126_v26 }
  0xf9   :  { %v344_v28 = vpop.eup %343 }
  0xfa   :  { %317 = vmatmul.mubr.msk.f32.vlgmr.msra.gmra.mrb[0].mxu1 %vm145_vm3, %v344_v28 }
 0x1cd   :  { %v215_v30 = vpop.f32.mrb[0].mxu1 }
 0x1ce   :  { %v216_v31 = vadd.f32 %v271_v29, %v215_v30  ;;  %v318_v32 = vpop.f32.mrb[1].mxu1 }
 0x1d0   :  { %345 = vtanh.f32 %v216_v31  ;;  %243 = vrot.lane.b32.xlu0 %v216_v31, %s389_s2 }
 0x1da   :  { %v346_v35 = vpop.eup %345 }
 0x1db   :  { %v229_v36 = vadd.f32 %v346_v35, %v228_v34 }
 0x1dd   :  { %v246_v42 = vsel %vm232_vm2, %v229_v36, %v238_v40 }
 0x1de   :  { %v248_v44 = vsel %vm247_vm4, %v246_v42, %v240_v41 }
 0x242   :  { %v244_v43 = vpop.permute.xlu0 %243 }
 0x243   :  { %v250_v45 = vsel %vm249_vm5, %v248_v44, %v244_v43 }
 0x244   :  { %v252_v46 = vsel %vm251_vm6, %v250_v45, 0.0 }
 0x245   :  { %253 = vst [vmem:[#allocation5] sm:$0xff] %v252_v46 }
 0x246   :  { %370 = shalt.err (!%p367_p9)
}
 0x247   :  { %s371_s3 = scalar_lea.hbm %s512_s8, 128 }
 0x248   :  { %p372_p10 = scmp.ne.s32.totalorder %s512_s8, %s371_s3  ;;  %p375_p11 = scmp.lt.u32.totalorder %s371_s3, %s512_s8 }
 0x24a   :  { %p377_p12 = pnand %p375_p11, %p372_p10 }
 0x24c   :  { %380 = shalt.err (!%p377_p12)
}
 0x24d   :  { %263 = dma.vmem_to_hbm [thread:$0]  %s261_s18, 128, %s512_s8, [#allocation3]  }
 0x24e   :  { %383 = dma.done.wait [#allocation3], 128  }
 0x24f   :  { %384 = vsyncadd [#allocation3], 4294967168 }
 0x250   :  { %267 = vsyncpa [#allocation3], 1 }
 0x251   :  { %268 = vsyncpa [#allocation4], 1 }

</bundles_post_ra>
